<compile_context>
chip_gen: v5e
topology: v5e:2x2
jax: 0.10.0
libtpu: 0.0.40
codegen_flags: <defaults>
</compile_context>

<pallas_src>
import jax
import jax.numpy as jnp
from jax.experimental import pallas as pl
from jax.experimental.pallas import tpu as pltpu

_LANES = 128
_MAX_TILE_ROWS = 2048  # 2048x128 f32 = 1 MiB/buffer; 4 MiB double-buffered total


def _cdiv(a, b):
    return -(-a // b)


def _round_up(x, m):
    return -(-x // m) * m


def _mae_kernel(out_ref, tgt_ref, acc_ref):
    """Accumulate per-lane sums of |o - t| into a resident (1,1,128) block."""
    j = pl.program_id(1)  # reduction axis within this core's row range

    @pl.when(j == 0)
    def _init():
        acc_ref[...] = jnp.zeros_like(acc_ref)

    # Upcast after load: bf16/fp16 inputs stream at half the HBM traffic.
    o = out_ref[...].astype(jnp.float32)
    t = tgt_ref[...].astype(jnp.float32)
    diff = jnp.abs(o - t)
    # Column (sublane-axis) reduction -> (1, 128) per-lane partial sums.
    acc_ref[...] += jnp.sum(diff, axis=0, keepdims=True)[None, :, :]


def mae_loss(output, target):
    """Returns (loss, loss_linear, loss_angular) matching torch MAELoss."""
    assert output.shape == target.shape
    assert output.ndim == 2 and output.shape[1] == 2, (
        "MAELoss kernel expects (N, 2) [linear, angular] inputs")
    n, c = output.shape
    total_elems = n * c

    # Sub-32-bit dtypes pack two rows per sublane -> align to 16 rows there.
    align = 16 if jnp.dtype(output.dtype).itemsize < 4 else 8

    # Minimal-padding tiling: no rounding up to a whole tile multiple.
    rows = _round_up(_cdiv(total_elems, _LANES), align)
    num_blocks = _cdiv(rows, _MAX_TILE_ROWS)
    num_cores = 2 if num_blocks >= 2 else 1          # v7x: split over 2 TCs
    num_blocks = _round_up(num_blocks, num_cores)
    blocks_per_core = num_blocks // num_cores
    tile_rows = _round_up(_cdiv(rows, num_blocks), align)
    padded_rows = tile_rows * num_blocks
    padded_elems = padded_rows * _LANES

    def _prep(x):
        x = x.reshape(-1)                        # row-major flatten: zero-copy
        if padded_elems != total_elems:
            # zeros in BOTH inputs -> |0-0| = 0; at most a few KiB of padding
            x = jnp.pad(x, (0, padded_elems - total_elems))
        return x.reshape(padded_rows, _LANES)    # lane-dense slab

    partials = pl.pallas_call(
        _mae_kernel,
        out_shape=jax.ShapeDtypeStruct((num_cores, 1, _LANES), jnp.float32),
        grid=(num_cores, blocks_per_core),
        in_specs=[
            pl.BlockSpec((tile_rows, _LANES),
                         lambda cc, j: (cc * blocks_per_core + j, 0)),
            pl.BlockSpec((tile_rows, _LANES),
                         lambda cc, j: (cc * blocks_per_core + j, 0)),
        ],
        # Per-core resident accumulator block (same block across the
        # "arbitrary" reduction axis, indexed by the parallel core axis).
        out_specs=pl.BlockSpec((1, 1, _LANES), lambda cc, j: (cc, 0, 0)),
        compiler_params=pltpu.CompilerParams(
            dimension_semantics=("parallel", "arbitrary")),
    )(_prep(output), _prep(target))

    # Tiny finalize on (num_cores, 1, 128): combine cores, even/odd-lane split
    # (lane parity == channel), then apply the means over the true N.
    linear_sum = jnp.sum(partials[..., 0::2])
    angular_sum = jnp.sum(partials[..., 1::2])
    loss = (linear_sum + angular_sum) / float(total_elems)
    loss_linear = linear_sum / float(n)
    loss_angular = angular_sum / float(n)
    return loss, loss_linear, loss_angular


def _reference(output, target):
    diff = jnp.abs(output.astype(jnp.float32) - target.astype(jnp.float32))
    return jnp.mean(diff), jnp.mean(diff[:, 0]), jnp.mean(diff[:, 1])


if __name__ == "__main__":
    key = jax.random.PRNGKey(0)

    def _check(batch, k):
        k1, k2 = jax.random.split(k)
        out = jax.random.normal(k1, (batch, 2), dtype=jnp.float32)
        tgt = jax.random.normal(k2, (batch, 2), dtype=jnp.float32)
        res = mae_loss(out, tgt)
        jax.block_until_ready(res)
        ref = _reference(out, tgt)
        for got, want in zip(res, ref):
            assert jnp.allclose(got, want, rtol=1e-5, atol=1e-6), (batch, got, want)

    keys = jax.random.split(key, 3)
    _check(8, keys[0])        # small batch: single block, padded tail
    _check(4096, keys[1])     # exact 8x128 alignment: zero-copy, no pad
    _check(300000, keys[2])   # multi-block grid, 2-way core split, ragged tail
    print("KERNEL_OK")
</pallas_src>

<mosaic_0001>
module attributes {stable_mosaic.version = 11 : i64} {
  func.func @_mae_kernel(%arg0: i32, %arg1: i32, %arg2: memref<8x128xf32, #tpu.memory_space<vmem>>, %arg3: memref<8x128xf32, #tpu.memory_space<vmem>>, %arg4: memref<1x1x128xf32, #tpu.memory_space<vmem>>) attributes {dimension_semantics = [#tpu.dimension_semantics<parallel>, #tpu.dimension_semantics<arbitrary>], iteration_bounds = array<i64: 1, 1>, scalar_prefetch = 0 : i64, scratch_operands = 0 : i64, tpu.core_type = #tpu.core_type<tc>, window_params = [{transform_indices = @transform_0, window_bounds = array<i64: 8, 128>}, {transform_indices = @transform_1, window_bounds = array<i64: 8, 128>}, {transform_indices = @transform_2, window_bounds = array<i64: 1, 1, 128>}]} {
    %c0_i32 = arith.constant 0 : i32
    %0 = arith.cmpi eq, %arg1, %c0_i32 : i32
    %1 = arith.extui %0 : i1 to i32
    %c0_i32_0 = arith.constant 0 : i32
    %2 = arith.cmpi ne, %1, %c0_i32_0 : i32
    scf.if %2 {
      %cst_10 = arith.constant 0.000000e+00 : f32
      %13 = vector.broadcast %cst_10 : f32 to vector<1x1x128xf32>
      %c0_11 = arith.constant 0 : index
      %c0_12 = arith.constant 0 : index
      %c0_13 = arith.constant 0 : index
      %14 = vector.load %arg4[%c0_11, %c0_12, %c0_13] : memref<1x1x128xf32, #tpu.memory_space<vmem>>, vector<1x1x128xf32>
      tpu.vector_store %arg4[%c0_11, %c0_12, %c0_13], %13 {strides = array<i32>} : memref<1x1x128xf32, #tpu.memory_space<vmem>>, vector<1x1x128xf32>,
    } else {
    }
    %c0 = arith.constant 0 : index
    %c0_1 = arith.constant 0 : index
    %3 = vector.load %arg2[%c0, %c0_1] : memref<8x128xf32, #tpu.memory_space<vmem>>, vector<8x128xf32>
    %c0_2 = arith.constant 0 : index
    %c0_3 = arith.constant 0 : index
    %4 = vector.load %arg3[%c0_2, %c0_3] : memref<8x128xf32, #tpu.memory_space<vmem>>, vector<8x128xf32>
    %5 = arith.subf %3, %4 : vector<8x128xf32>
    %6 = math.absf %5 : vector<8x128xf32>
    %c0_4 = arith.constant 0 : index
    %c0_5 = arith.constant 0 : index
    %c0_6 = arith.constant 0 : index
    %7 = vector.load %arg4[%c0_4, %c0_5, %c0_6] : memref<1x1x128xf32, #tpu.memory_space<vmem>>, vector<1x1x128xf32>
    %cst = arith.constant dense<0.000000e+00> : vector<128xf32>
    %8 = vector.multi_reduction <add>, %6, %cst [0] : vector<8x128xf32> to vector<128xf32>
    %9 = vector.shape_cast %8 : vector<128xf32> to vector<1x128xf32>
    %10 = vector.shape_cast %9 : vector<1x128xf32> to vector<1x1x128xf32>
    %11 = arith.addf %7, %10 : vector<1x1x128xf32>
    %c0_7 = arith.constant 0 : index
    %c0_8 = arith.constant 0 : index
    %c0_9 = arith.constant 0 : index
    %12 = vector.load %arg4[%c0_7, %c0_8, %c0_9] : memref<1x1x128xf32, #tpu.memory_space<vmem>>, vector<1x1x128xf32>
    tpu.vector_store %arg4[%c0_7, %c0_8, %c0_9], %11 {strides = array<i32>} : memref<1x1x128xf32, #tpu.memory_space<vmem>>, vector<1x1x128xf32>,
    return
  }
  func.func @transform_0(%arg0: i32, %arg1: i32) -> (i32, i32) {
    %c1_i32 = arith.constant 1 : i32
    %0 = arith.muli %arg0, %c1_i32 : i32
    %1 = arith.addi %0, %arg1 : i32
    %c0_i32 = arith.constant 0 : i32
    %c0_i32_0 = arith.constant 0 : i32
    return %1, %c0_i32 : i32, i32
  }
  func.func @transform_1(%arg0: i32, %arg1: i32) -> (i32, i32) {
    %c1_i32 = arith.constant 1 : i32
    %0 = arith.muli %arg0, %c1_i32 : i32
    %1 = arith.addi %0, %arg1 : i32
    %c0_i32 = arith.constant 0 : i32
    %c0_i32_0 = arith.constant 0 : i32
    return %1, %c0_i32 : i32, i32
  }
  func.func @transform_2(%arg0: i32, %arg1: i32) -> (i32, i32, i32) {
    %c0_i32 = arith.constant 0 : i32
    %c0_i32_0 = arith.constant 0 : i32
    %c0_i32_1 = arith.constant 0 : i32
    return %arg0, %c0_i32, %c0_i32_0 : i32, i32, i32
  }
}

</mosaic_0001>

<bundles_post_ra>
// kernel: tpu_custom_call.1
= control target key start
LH: loop header
LB: loop body
LE: loop exit
PB: predicated region body
PF: predicated region fallthrough
CT: control target
= control target key end

     0   :  { %7 = vsyncpa [#allocation3], 0  ;;  %s194_s0 = inlined_call_operand.hbm [shape: f32[8,128], index: 0, kind: input, shape index: {}]   ;;  %s195_s1 = inlined_call_operand.hbm [shape: f32[8,128], index: 1, kind: input, shape index: {}]   ;;  %s196_s2 = inlined_call_operand.hbm [shape: f32[1,1,128], index: 2, kind: output, shape index: {}]  }
   0x1   :  { %8 = vsyncpa [#allocation6], 0 }
   0x2   :  { %9 = vsyncpa [#allocation4], 0  ;;  %s18_s11 = sshll.u32 %s194_s0, 4  ;;  %s166_s12 = smov [#allocation2]   ;;  %s19_s11 = int_to_ptr.hbm [resolvable:$true] %s18_s11 }
   0x3   :  { %s20_s13 = sshll.u32 %s166_s12, 4  ;;  %s32_s16 = sshll.u32 %s195_s1, 4  ;;  %s21_s13 = int_to_ptr.vmem [resolvable:$true] %s20_s13  ;;  %s33_s16 = int_to_ptr.hbm [resolvable:$true] %s32_s16 }
   0x4   :  { %23 = dma.hbm_to_vmem [thread:$0]  %s19_s11, 128, %s21_s13, [#allocation3]  }
   0x5   :  { %s167_s17 = smov [#allocation5]  }
   0x6   :  { %s34_s18 = sshll.u32 %s167_s17, 4  ;;  %s35_s18 = int_to_ptr.vmem [resolvable:$true] %s34_s18 }
   0x7   :  { %37 = dma.hbm_to_vmem [thread:$0]  %s33_s16, 128, %s35_s18, [#allocation6]  }
   0x8   :  { %160 = dma.done.wait [#allocation3], 128  }
   0x9   :  { %161 = vsyncadd [#allocation3], 4294967168 }
   0xa   :  { %162 = dma.done.wait [#allocation6], 128  }
   0xb   :  { %163 = vsyncadd [#allocation6], 4294967168  ;;  %v168_v0 = vmov 0.0   ;;  %v53_v1 = vld [vmem:[#allocation2] sm:$0xff]  ;;  %v54_v2 = vld [vmem:[#allocation5] sm:$0xff]  ;;  %s169_s0 = smov [#allocation7]  }
   0xc   :  { %52 = vst [vmem:[#allocation7] sm:$0x1] %v168_v0  ;;  %v55_v3 = vsub.f32 %v53_v1, %v54_v2  ;;  %s71_s1 = sshll.u32 %s169_s0, 4  ;;  %s73_s21 = sshll.u32 %s196_s2, 4  ;;  %s72_s1 = int_to_ptr.vmem [resolvable:$true] %s71_s1  ;;  %s74_s21 = int_to_ptr.hbm [resolvable:$true] %s73_s21 }
   0xe   :  { %v56_v4 = vand.u32 2147483647, %v55_v3 }
  0x10   :  { %v58_v5 = vrot.slane %v56_v4, 4 }
  0x12   :  { %v59_v6 = vadd.f32 %v58_v5, %v56_v4 }
  0x13   :  { %v57_v10 = vld [vmem:[#allocation7] sm:$0x1] }
  0x14   :  { %v60_v7 = vrot.slane %v59_v6, 2 }
  0x16   :  { %v61_v8 = vadd.f32 %v60_v7, %v59_v6 }
  0x18   :  { %v62_v9 = vrot.slane %v61_v8, 1 }
  0x1a   :  { %v63_v11 = vadd.f32 %v62_v9, %v61_v8 }
  0x1c   :  { %v64_v12 = vadd.f32 %v63_v11, %v57_v10 }
  0x1e   :  { %65 = vst [vmem:[#allocation7] sm:$0x1] %v64_v12 }
  0x1f   :  { %76 = dma.vmem_to_hbm [thread:$0]  %s72_s1, 16, %s74_s21, [#allocation4]  }
  0x20   :  { %164 = dma.done.wait [#allocation4], 16  }
  0x21   :  { %165 = vsyncadd [#allocation4], 4294967280 }
  0x22   :  { %81 = vsyncpa [#allocation3], 1 }
  0x23   :  { %82 = vsyncpa [#allocation6], 1 }
  0x24   :  { %83 = vsyncpa [#allocation4], 1 }

</bundles_post_ra>
